<compile_context>
chip_gen: v7x
topology: tpu7x:2x2x1
jax: 0.10.0
libtpu: 0.0.40
codegen_flags: <defaults>
</compile_context>

<pallas_src>
import functools

import numpy as np
import jax
import jax.numpy as jnp
from jax.experimental import pallas as pl
from jax.experimental.pallas import tpu as pltpu


# -----------------------------------------------------------------------------
# Fused conv1+bn1+relu -> conv2+bn2 -> running max; bias2+relu at finalize.
# -----------------------------------------------------------------------------
def _fused_conv_pool_kernel(x_ref, w1_ref, b1_ref, w2_ref, b2_ref,
                            pooled_ref, *acc_refs,
                            n_points, tiles_per_chunk, needs_mask):
    """One (batch, point_chunk, point_tile) grid step."""
    c = pl.program_id(1)
    t = pl.program_id(2)

    x_blk = x_ref[0].astype(jnp.bfloat16)                      # (k, TN), in-kernel cast
    tn = x_blk.shape[1]

    # stage 1: k -> 128 (pointwise conv, BN folded, relu); f32 accumulation.
    h1 = jnp.dot(w1_ref[...], x_blk, preferred_element_type=jnp.float32)
    h1 = jnp.maximum(h1 + b1_ref[...], 0.0)                    # (128, TN)

    # stage 2: 128 -> H1, bias/relu deferred to finalize.
    h2 = jnp.dot(w2_ref[...], h1.astype(jnp.bfloat16),
                 preferred_element_type=jnp.float32)            # (H1, TN)

    if needs_mask:
        # Only the globally last tile can be partial: mask out-of-range lanes
        # to -inf so they can never win the max (static no-op if N % TN == 0).
        col0 = (c * tiles_per_chunk + t) * tn
        lane = jax.lax.broadcasted_iota(jnp.int32, (1, tn), 1)
        h2 = jnp.where(col0 + lane < n_points, h2, -jnp.inf)

    def _finish(m):
        # Deferred bn2 bias + ReLU on the reduced (H1, 1) vector.
        pooled_ref[0, 0] = jnp.maximum(m + b2_ref[...], 0.0)

    if not acc_refs:
        # Single point tile per chunk: no scratch round-trip, no pl.when.
        _finish(jnp.max(h2, axis=-1, keepdims=True))
    else:
        acc_ref = acc_refs[0]

        @pl.when(t == 0)
        def _init():
            acc_ref[...] = jnp.full(acc_ref.shape, -jnp.inf, acc_ref.dtype)

        acc_ref[...] = jnp.maximum(acc_ref[...], h2)

        @pl.when(t == pl.num_programs(2) - 1)
        def _finalize():
            _finish(jnp.max(acc_ref[...], axis=-1, keepdims=True))


def _fused_conv_pool(x, w1, b1, w2, b2, *, tn_cap=2048, point_chunks=None):
    """x: (B, k, N) f32; weights bf16; biases f32 (C, 1).  Returns (B, H1) f32."""
    B, k, N = x.shape
    c1 = w1.shape[0]
    h1_dim = w2.shape[0]

    tn_cap = max(128, (tn_cap // 128) * 128)
    tn = min(tn_cap, pl.cdiv(N, 128) * 128)        # lane-dense tile, no wrapper pad
    n_tiles = pl.cdiv(N, tn)

    if point_chunks is None:
        # Give both v7x TensorCores work when the batch axis alone can't.
        point_chunks = 2 if (B == 1 and n_tiles >= 2 and n_tiles % 2 == 0) else 1
    if n_tiles % point_chunks != 0:
        point_chunks = 1
    tpc = n_tiles // point_chunks
    needs_mask = (N % tn) != 0

    kernel = functools.partial(
        _fused_conv_pool_kernel,
        n_points=N, tiles_per_chunk=tpc, needs_mask=needs_mask)

    # Skip the running-max scratch entirely when each chunk is a single tile.
    scratch = [] if tpc == 1 else [pltpu.VMEM((h1_dim, tn), jnp.float32)]

    pooled = pl.pallas_call(
        kernel,
        out_shape=jax.ShapeDtypeStruct((B, point_chunks, h1_dim, 1), jnp.float32),
        grid_spec=pltpu.PrefetchScalarGridSpec(
            num_scalar_prefetch=0,
            grid=(B, point_chunks, tpc),
            in_specs=[
                pl.BlockSpec((1, k, tn), lambda b, c, t: (b, 0, c * tpc + t)),
                pl.BlockSpec((c1, k), lambda b, c, t: (0, 0)),        # W1 resident
                pl.BlockSpec((c1, 1), lambda b, c, t: (0, 0)),        # b1 resident
                pl.BlockSpec((h1_dim, c1), lambda b, c, t: (0, 0)),   # W2 resident
                pl.BlockSpec((h1_dim, 1), lambda b, c, t: (0, 0)),    # b2 resident
            ],
            out_specs=pl.BlockSpec((1, 1, h1_dim, 1),
                                   lambda b, c, t: (b, c, 0, 0)),
            scratch_shapes=scratch,
        ),
        compiler_params=pltpu.CompilerParams(
            dimension_semantics=("parallel", "parallel", "arbitrary")),
    )(x, w1, b1, w2, b2)

    # Combine per-chunk partial maxima (no-op reduce when point_chunks == 1).
    return jnp.max(pooled[:, :, :, 0], axis=1)                  # (B, H1)


# -----------------------------------------------------------------------------
# Host-side glue: BN folding (f32) and the tiny fc tail.
# -----------------------------------------------------------------------------
def _fold_bn(w, b, gamma, beta, mean, var, eps=1e-5):
    """Fold an inference-mode BatchNorm into the preceding linear (all f32)."""
    scale = gamma / jnp.sqrt(var + eps)
    return w * scale[:, None], (b - mean) * scale + beta


def shallow_stnkd_forward(x, params, *, tn_cap=2048, point_chunks=None):
    """x: (B, k, N) float32 (PyTorch NCW).  Returns (B, k, k) float32."""
    B, k, N = x.shape
    p = params

    w1, b1 = _fold_bn(p["conv1_w"], p["conv1_b"],
                      p["bn1_g"], p["bn1_b"], p["bn1_m"], p["bn1_v"])
    w2, b2 = _fold_bn(p["conv2_w"], p["conv2_b"],
                      p["bn2_g"], p["bn2_b"], p["bn2_m"], p["bn2_v"])
    w3, b3 = _fold_bn(p["fc1_w"], p["fc1_b"],
                      p["bn3_g"], p["bn3_b"], p["bn3_m"], p["bn3_v"])
    w4, b4 = p["fc2_w"], p["fc2_b"]

    pooled = _fused_conv_pool(
        x,
        w1.astype(jnp.bfloat16), b1.reshape(-1, 1),
        w2.astype(jnp.bfloat16), b2.reshape(-1, 1),
        tn_cap=tn_cap, point_chunks=point_chunks)               # (B, H1) f32

    # Tiny tail: fc1 -> relu -> fc2 + identity, plain XLA in f32.
    f = jax.nn.relu(pooled @ w3.T + b3)                         # (B, H2)
    out = f @ w4.T + b4 + jnp.eye(k, dtype=jnp.float32).reshape(-1)
    return out.reshape(B, k, k)


# -----------------------------------------------------------------------------
# Pure-JAX f32 reference (inference-mode BN), for a sanity check.
# -----------------------------------------------------------------------------
def reference_forward(x, params):
    B, k, N = x.shape
    p = params
    w1, b1 = _fold_bn(p["conv1_w"], p["conv1_b"],
                      p["bn1_g"], p["bn1_b"], p["bn1_m"], p["bn1_v"])
    w2, b2 = _fold_bn(p["conv2_w"], p["conv2_b"],
                      p["bn2_g"], p["bn2_b"], p["bn2_m"], p["bn2_v"])
    w3, b3 = _fold_bn(p["fc1_w"], p["fc1_b"],
                      p["bn3_g"], p["bn3_b"], p["bn3_m"], p["bn3_v"])
    h1 = jax.nn.relu(jnp.einsum("ok,bkn->bon", w1, x) + b1[None, :, None])
    h2 = jax.nn.relu(jnp.einsum("oc,bcn->bon", w2, h1) + b2[None, :, None])
    pooled = jnp.max(h2, axis=-1)
    f = jax.nn.relu(pooled @ w3.T + b3)
    out = f @ p["fc2_w"].T + p["fc2_b"] + jnp.eye(k, dtype=jnp.float32).reshape(-1)
    return out.reshape(B, k, k)


if __name__ == "__main__":
    # Small shapes consistent with the module (conv1 output is fixed at 128).
    k = 16
    C1, H1, H2 = 128, 128, 64

    key = jax.random.PRNGKey(0)
    ks = jax.random.split(key, 22)

    def nrm(kk, shape, scale):
        return scale * jax.random.normal(kk, shape, jnp.float32)

    params = dict(
        conv1_w=nrm(ks[0], (C1, k), 1.0 / np.sqrt(k)),    # PyTorch (128, k, 1) squeezed
        conv1_b=nrm(ks[1], (C1,), 0.05),
        conv2_w=nrm(ks[2], (H1, C1), 1.0 / np.sqrt(C1)),
        conv2_b=nrm(ks[3], (H1,), 0.05),
        fc1_w=nrm(ks[4], (H2, H1), 1.0 / np.sqrt(H1)),
        fc1_b=nrm(ks[5], (H2,), 0.05),
        fc2_w=nrm(ks[6], (k * k, H2), 1.0 / np.sqrt(H2)),
        fc2_b=nrm(ks[7], (k * k,), 0.05),
        bn1_g=1.0 + 0.1 * jax.random.normal(ks[8], (C1,), jnp.float32),
        bn1_b=nrm(ks[9], (C1,), 0.05),
        bn1_m=nrm(ks[10], (C1,), 0.05),
        bn1_v=jnp.abs(1.0 + 0.1 * jax.random.normal(ks[11], (C1,), jnp.float32)),
        bn2_g=1.0 + 0.1 * jax.random.normal(ks[12], (H1,), jnp.float32),
        bn2_b=nrm(ks[13], (H1,), 0.05),
        bn2_m=nrm(ks[14], (H1,), 0.05),
        bn2_v=jnp.abs(1.0 + 0.1 * jax.random.normal(ks[15], (H1,), jnp.float32)),
        bn3_g=1.0 + 0.1 * jax.random.normal(ks[16], (H2,), jnp.float32),
        bn3_b=nrm(ks[17], (H2,), 0.05),
        bn3_m=nrm(ks[18], (H2,), 0.05),
        bn3_v=jnp.abs(1.0 + 0.1 * jax.random.normal(ks[19], (H2,), jnp.float32)),
    )

    # Config 1: B=2, N=384 -> single lane-dense tile per batch element
    # (no mask, no scratch, no point chunks).
    B1, N1 = 2, 384
    x1 = jax.random.normal(ks[20], (B1, k, N1), jnp.float32)
    fwd1 = jax.jit(functools.partial(shallow_stnkd_forward, tn_cap=2048))
    out1 = jax.block_until_ready(fwd1(x1, params))
    assert out1.shape == (B1, k, k)
    np.testing.assert_allclose(np.asarray(out1), np.asarray(reference_forward(x1, params)),
                               rtol=5e-2, atol=1.5e-1)

    # Config 2: B=1, N=900, tn_cap=256 -> 4 tiles, partial-tile masking, and
    # the 2-way point-chunk "parallel" split (both TCs busy on v7x).
    B2, N2 = 1, 900
    x2 = jax.random.normal(ks[21], (B2, k, N2), jnp.float32)
    fwd2 = jax.jit(functools.partial(shallow_stnkd_forward, tn_cap=256))
    out2 = jax.block_until_ready(fwd2(x2, params))
    assert out2.shape == (B2, k, k)
    np.testing.assert_allclose(np.asarray(out2), np.asarray(reference_forward(x2, params)),
                               rtol=5e-2, atol=1.5e-1)

    print("KERNEL_OK")
</pallas_src>

<mosaic_0001>
module attributes {stable_mosaic.version = 11 : i64} {
  func.func @_fused_conv_pool_kernel(%arg0: i32, %arg1: i32, %arg2: i32, %arg3: memref<1x16x384xf32, #tpu.memory_space<vmem>>, %arg4: memref<128x16xbf16, #tpu.memory_space<vmem>>, %arg5: memref<128x1xf32, #tpu.memory_space<vmem>>, %arg6: memref<128x128xbf16, #tpu.memory_space<vmem>>, %arg7: memref<128x1xf32, #tpu.memory_space<vmem>>, %arg8: memref<1x1x128x1xf32, #tpu.memory_space<vmem>>) attributes {dimension_semantics = [#tpu.dimension_semantics<parallel>, #tpu.dimension_semantics<parallel>, #tpu.dimension_semantics<arbitrary>], iteration_bounds = array<i64: 2, 1, 1>, scalar_prefetch = 0 : i64, scratch_operands = 0 : i64, tpu.core_type = #tpu.core_type<tc>, window_params = [{transform_indices = @transform_0, window_bounds = array<i64: 1, 16, 384>}, {pipeline_mode = #tpu.pipeline_mode<synchronous>, transform_indices = @transform_1, window_bounds = array<i64: 128, 16>}, {pipeline_mode = #tpu.pipeline_mode<synchronous>, transform_indices = @transform_2, window_bounds = array<i64: 128, 1>}, {pipeline_mode = #tpu.pipeline_mode<synchronous>, transform_indices = @transform_3, window_bounds = array<i64: 128, 128>}, {pipeline_mode = #tpu.pipeline_mode<synchronous>, transform_indices = @transform_4, window_bounds = array<i64: 128, 1>}, {transform_indices = @transform_5, window_bounds = array<i64: 1, 1, 128, 1>}]} {
    %c0 = arith.constant 0 : index
    %c0_0 = arith.constant 0 : index
    %c0_1 = arith.constant 0 : index
    %0 = vector.load %arg3[%c0, %c0_0, %c0_1] : memref<1x16x384xf32, #tpu.memory_space<vmem>>, vector<1x16x384xf32>
    %1 = vector.shape_cast %0 : vector<1x16x384xf32> to vector<16x384xf32>
    %2 = arith.truncf %1 : vector<16x384xf32> to vector<16x384xbf16>
    %c0_2 = arith.constant 0 : index
    %c0_3 = arith.constant 0 : index
    %3 = vector.load %arg4[%c0_2, %c0_3] : memref<128x16xbf16, #tpu.memory_space<vmem>>, vector<128x16xbf16>
    %cst = arith.constant dense<0.000000e+00> : vector<128x384xf32>
    %4 = tpu.matmul %3, %2, %cst {dimension_numbers = #tpu.dot_dimension_numbers<[1], [0], [0], [1], [0, 0, 1, 1], [], []>} : vector<128x16xbf16>, vector<16x384xbf16>, vector<128x384xf32> -> vector<128x384xf32>
    %c0_4 = arith.constant 0 : index
    %c0_5 = arith.constant 0 : index
    %5 = vector.load %arg5[%c0_4, %c0_5] : memref<128x1xf32, #tpu.memory_space<vmem>>, vector<128x1xf32>
    %6 = vector.broadcast %5 : vector<128x1xf32> to vector<128x384xf32>
    %7 = arith.addf %4, %6 : vector<128x384xf32>
    %cst_6 = arith.constant 0.000000e+00 : f32
    %8 = vector.broadcast %cst_6 : f32 to vector<128x384xf32>
    %9 = arith.maximumf %7, %8 : vector<128x384xf32>
    %c0_7 = arith.constant 0 : index
    %c0_8 = arith.constant 0 : index
    %10 = vector.load %arg6[%c0_7, %c0_8] : memref<128x128xbf16, #tpu.memory_space<vmem>>, vector<128x128xbf16>
    %11 = arith.truncf %9 : vector<128x384xf32> to vector<128x384xbf16>
    %cst_9 = arith.constant dense<0.000000e+00> : vector<128x384xf32>
    %12 = tpu.matmul %10, %11, %cst_9 {dimension_numbers = #tpu.dot_dimension_numbers<[1], [0], [0], [1], [0, 0, 1, 1], [], []>} : vector<128x128xbf16>, vector<128x384xbf16>, vector<128x384xf32> -> vector<128x384xf32>
    %cst_10 = arith.constant dense<0xFF800000> : vector<128xf32>
    %13 = vector.multi_reduction <maximumf>, %12, %cst_10 [1] : vector<128x384xf32> to vector<128xf32>
    %14 = vector.shape_cast %13 : vector<128xf32> to vector<128x1xf32>
    %c0_11 = arith.constant 0 : index
    %c0_12 = arith.constant 0 : index
    %15 = vector.load %arg7[%c0_11, %c0_12] : memref<128x1xf32, #tpu.memory_space<vmem>>, vector<128x1xf32>
    %16 = arith.addf %14, %15 : vector<128x1xf32>
    %cst_13 = arith.constant 0.000000e+00 : f32
    %17 = vector.broadcast %cst_13 : f32 to vector<128x1xf32>
    %18 = arith.maximumf %16, %17 : vector<128x1xf32>
    %c0_14 = arith.constant 0 : index
    %c0_15 = arith.constant 0 : index
    %c0_16 = arith.constant 0 : index
    %c0_17 = arith.constant 0 : index
    %19 = vector.load %arg8[%c0_14, %c0_15, %c0_16, %c0_17] : memref<1x1x128x1xf32, #tpu.memory_space<vmem>>, vector<1x1x128x1xf32>
    %20 = vector.shape_cast %19 : vector<1x1x128x1xf32> to vector<128x1xf32>
    %21 = vector.shape_cast %18 : vector<128x1xf32> to vector<1x1x128x1xf32>
    tpu.vector_store %arg8[%c0_14, %c0_15, %c0_16, %c0_17], %21 {strides = array<i32>} : memref<1x1x128x1xf32, #tpu.memory_space<vmem>>, vector<1x1x128x1xf32>,
    return
  }
  func.func @transform_0(%arg0: i32, %arg1: i32, %arg2: i32) -> (i32, i32, i32) {
    %c1_i32 = arith.constant 1 : i32
    %0 = arith.muli %arg1, %c1_i32 : i32
    %1 = arith.addi %0, %arg2 : i32
    %c0_i32 = arith.constant 0 : i32
    %c0_i32_0 = arith.constant 0 : i32
    return %arg0, %c0_i32, %1 : i32, i32, i32
  }
  func.func @transform_1(%arg0: i32, %arg1: i32, %arg2: i32) -> (i32, i32) {
    %c0_i32 = arith.constant 0 : i32
    %c0_i32_0 = arith.constant 0 : i32
    %c0_i32_1 = arith.constant 0 : i32
    return %c0_i32, %c0_i32_0 : i32, i32
  }
  func.func @transform_2(%arg0: i32, %arg1: i32, %arg2: i32) -> (i32, i32) {
    %c0_i32 = arith.constant 0 : i32
    %c0_i32_0 = arith.constant 0 : i32
    %c0_i32_1 = arith.constant 0 : i32
    return %c0_i32, %c0_i32_0 : i32, i32
  }
  func.func @transform_3(%arg0: i32, %arg1: i32, %arg2: i32) -> (i32, i32) {
    %c0_i32 = arith.constant 0 : i32
    %c0_i32_0 = arith.constant 0 : i32
    %c0_i32_1 = arith.constant 0 : i32
    return %c0_i32, %c0_i32_0 : i32, i32
  }
  func.func @transform_4(%arg0: i32, %arg1: i32, %arg2: i32) -> (i32, i32) {
    %c0_i32 = arith.constant 0 : i32
    %c0_i32_0 = arith.constant 0 : i32
    %c0_i32_1 = arith.constant 0 : i32
    return %c0_i32, %c0_i32_0 : i32, i32
  }
  func.func @transform_5(%arg0: i32, %arg1: i32, %arg2: i32) -> (i32, i32, i32, i32) {
    %c0_i32 = arith.constant 0 : i32
    %c0_i32_0 = arith.constant 0 : i32
    %c0_i32_1 = arith.constant 0 : i32
    return %arg0, %arg1, %c0_i32, %c0_i32_0 : i32, i32, i32, i32
  }
}

</mosaic_0001>

<bundles_post_ra>
// kernel: shallow_stnkd_forward.1
= control target key start
LH: loop header
LB: loop body
LE: loop exit
PB: predicated region body
PF: predicated region fallthrough
CT: control target
= control target key end

     0   :  { %s1458_s18 = smov 0   ;;  %s1460_s19 = smov 0   ;;  %s1797_s0 = inlined_call_operand.vmem [shape: f32[2,16,384], index: 0, kind: input, shape index: {}]   ;;  %s1798_s1 = inlined_call_operand.vmem [shape: bf16[128,16], index: 1, kind: input, shape index: {}]   ;;  %s1799_s2 = inlined_call_operand.vmem [shape: f32[128,1], index: 2, kind: input, shape index: {}]   ;;  %s1800_s3 = inlined_call_operand.vmem [shape: bf16[128,128], index: 3, kind: input, shape index: {}]   ;;  %s1801_s4 = inlined_call_operand.vmem [shape: f32[128,1], index: 4, kind: input, shape index: {}]   ;;  %s1802_s5 = inlined_call_operand.vmem [shape: f32[2,1,128,1], index: 5, kind: output, shape index: {}]  }
   0x1   :  { %s1462_s20 = smov 0  }
   0x2 LB: > { %s34_s21 = sadd.s32 1, %s1421_s19  ;;  %p1245_p0 = scmp.ge.s32.totalorder %s1425_s20, 1  ;;  %s1425_s20 = sphi %s1462_s20, %s15_s20   ;;  %s1421_s19 = sphi %s1460_s19, %s1804_s19   ;;  %s1417_s18 = sphi %s1458_s18, %s1803_s18  }
   0x3   : > { %p36_p1 = scmp.ge.s32.totalorder %s34_s21, 2  ;;  %p219_p2 = scmp.lt.s32.totalorder %s1425_s20, 3 }
   0x5   : > { %s1806_s21 = smov (%p36_p1, %s34_s21), 0  ;;  %p220_p3 = pnand %p1245_p0, %p219_p2 }
   0x6   : > { %p258_p4 = scmp.lt.s32.totalorder (!%p220_p3), %s1417_s18, 1  ;;  %v1427_v0 = vmov (!%p220_p3), 0   ;;  %v1387_v1 = vld [vmem:[%s1798_s1] sm:$0xff] (!%p220_p3)   ;;  %vm439_vm0 = vcmask (!%p220_p3), 130048   ;;  %v305_v12 = vld [vmem:[%s1799_s2 + $0x10] sm:$0xff] (!%p220_p3)  ;;  %v1388_v13 = vld [vmem:[%s1798_s1 + $0x8] sm:$0xff] (!%p220_p3)  }
   0x7   : > { %223 = sbr.rel (%p220_p3) target bundleno = 728 (0x2d8), region = 40  ;;  %496 = vmatprep.mubr.bf16.mxu0 (!%p220_p3), %v1427_v0  ;;  %1385 = vset.pattern.permute.xlu0 (!%p220_p3), %v1427_v0  ;;  %v303_v11 = vld [vmem:[%s1799_s2] sm:$0xff] (!%p220_p3)  ;;  %v1389_v14 = vld [vmem:[%s1798_s1 + $0x10] sm:$0xff] (!%p220_p3)   ;;  %v304_v15 = vld [vmem:[%s1799_s2 + $0x8] sm:$0xff] (!%p220_p3)  ;;  %vm1132_vm1 = vcmask (!%p220_p3), 7168  }
   0x8   : > { %1386 = vset.pattern.permute.xlu1 (!%p220_p3), %v1427_v0  ;;  %1311 = vmatprep.mubr.msk.bf16.mxu1 (!%p220_p3), %vm439_vm0, %v1387_v1  ;;  %v306_v16 = vld [vmem:[%s1799_s2 + $0x18] sm:$0xff] (!%p220_p3)  ;;  %v307_v17 = vld [vmem:[%s1799_s2 + $0x20] sm:$0xff] (!%p220_p3)  ;;  %v308_v18 = vld [vmem:[%s1799_s2 + $0x28] sm:$0xff] (!%p220_p3) }
   0x9   : > { %321 = vperm.xlu0 (!%p220_p3), %1385, %v303_v11   ;;  %331 = vperm.xlu1 (!%p220_p3), %1386, %v305_v12   ;;  %v1390_v19 = vld [vmem:[%s1798_s1 + $0x18] sm:$0xff] (!%p220_p3)   ;;  %v1391_v20 = vld [vmem:[%s1798_s1 + $0x20] sm:$0xff] (!%p220_p3)   ;;  %v309_v21 = vld [vmem:[%s1799_s2 + $0x30] sm:$0xff] (!%p220_p3) }
   0xa   : > { %v310_v22 = vld [vmem:[%s1799_s2 + $0x38] sm:$0xff] (!%p220_p3)  ;;  %v311_v23 = vld [vmem:[%s1799_s2 + $0x40] sm:$0xff] (!%p220_p3)  ;;  %v312_v24 = vld [vmem:[%s1799_s2 + $0x48] sm:$0xff] (!%p220_p3) }
   0xb   : > { %v1392_v25 = vld [vmem:[%s1798_s1 + $0x28] sm:$0xff] (!%p220_p3)   ;;  %v1393_v26 = vld [vmem:[%s1798_s1 + $0x30] sm:$0xff] (!%p220_p3)   ;;  %v314_v28 = vld [vmem:[%s1799_s2 + $0x58] sm:$0xff] (!%p220_p3) }
   0xc   : > { %v313_v27 = vld [vmem:[%s1799_s2 + $0x50] sm:$0xff] (!%p220_p3)  ;;  %v315_v29 = vld [vmem:[%s1799_s2 + $0x60] sm:$0xff] (!%p220_p3)  ;;  %v316_v30 = vld [vmem:[%s1799_s2 + $0x68] sm:$0xff] (!%p220_p3) }
   0xd   : > { %326 = vperm.xlu0 (!%p220_p3), %1385, %v304_v15   ;;  %336 = vperm.xlu1 (!%p220_p3), %1386, %v306_v16   ;;  %v1394_v31 = vld [vmem:[%s1798_s1 + $0x38] sm:$0xff] (!%p220_p3)   ;;  %v317_v32 = vld [vmem:[%s1799_s2 + $0x70] sm:$0xff] (!%p220_p3)  ;;  %v1584_v34 = vld [vmem:[%s1800_s3] sm:$0xff] (!%p220_p3)  }
   0xe   : > { %s1808_s18 = smov (!%p258_p4, %s1417_s18), 1  ;;  %v318_v33 = vld [vmem:[%s1799_s2 + $0x78] sm:$0xff] }
   0xf   : > { %s1359_s24 = smul.u32 48, %s1808_s18  ;;  %s1283_s29 = sshll.u32 %s1808_s18, 7 }
  0x10   : > { %s1712_s9 = scalar_lea.vmem %s1802_s5, %s1283_s29 }
  0x11   : > { %s265_s27 = scalar_lea.vmem %s1797_s0, %s1359_s24  ;;  %341 = vperm.xlu0 %1385, %v307_v17   ;;  %346 = vperm.xlu1 %1386, %v308_v18  }
  0x12   : > { %v279_v2 = vld [vmem:[%s265_s27 + $0x8] sm:$0xff]  ;;  %v282_v3 = vld [vmem:[%s265_s27 + $0x20] sm:$0xff]  ;;  %v280_v4 = vld [vmem:[%s265_s27 + $0x10] sm:$0xff] }
  0x13   : > { %v285_v5 = vpack.c.bf16 %v282_v3, %v279_v2  ;;  %v283_v6 = vld [vmem:[%s265_s27 + $0x28] sm:$0xff]  ;;  %v278_v7 = vld [vmem:[%s265_s27] sm:$0xff]  ;;  %v281_v8 = vld [vmem:[%s265_s27 + $0x18] sm:$0xff] }
  0x14   : > { %v286_v9 = vpack.c.bf16 %v283_v6, %v280_v4  ;;  %v284_v10 = vpack.c.bf16 %v281_v8, %v278_v7 }
  0x15   : > { %464 = vmatprep.subr.bf16.mxu0 %v285_v5  ;;  %351 = vperm.xlu0 %1385, %v309_v21  }
  0x16   : > { %1309 = vmatprep.subr.bf16.mxu1 %v286_v9  ;;  %465 = vmatpush1.bf16.msra.mxu0 %v284_v10 }
  0x17   : > { %1310 = vmatpush3.bf16.msra.mxu1 %v286_v9  ;;  %356 = vperm.xlu1 %1386, %v310_v22  }
  0x19   : > { %1257 = vmatmul.mubr.msk.bf16.vlgmr.msra.gmra.mrb[0].mxu0 %vm439_vm0, %v1387_v1  ;;  %361 = vperm.xlu0 %1385, %v311_v23  }
  0x1a   : > { %1312 = vmatmul.mubr.msk.bf16.vlgmr.msra.gmra.mrb[0].mxu1 %vm439_vm0, %v1388_v13  ;;  %506 = vmatprep.mubr.bf16.mxu0 %v1427_v0 }
  0x1b   : > { %1315 = vmatprep.mubr.msk.bf16.mxu1 %vm439_vm0, %v1389_v14  ;;  %366 = vperm.xlu1 %1386, %v312_v24  }
  0x1d   : > { %371 = vperm.xlu0 %1385, %v313_v27  }
  0x1f   : > { %376 = vperm.xlu1 %1386, %v314_v28  }
  0x21   : > { %1258 = vmatmul.mubr.msk.bf16.gmra.mrb[4].mxu0 %vm439_vm0, %v1388_v13  ;;  %381 = vperm.xlu0 %1385, %v315_v29  }
  0x22   : > { %1316 = vmatmul.mubr.msk.bf16.gmra.mrb[4].mxu1 %vm439_vm0, %v1390_v19  ;;  %516 = vmatprep.mubr.bf16.mxu0 %v1427_v0 }
  0x23   : > { %1319 = vmatprep.mubr.msk.bf16.mxu1 %vm439_vm0, %v1391_v20  ;;  %386 = vperm.xlu1 %1386, %v316_v30  }
  0x25   : > { %391 = vperm.xlu0 %1385, %v317_v32  }
  0x27   : > { %396 = vperm.xlu1 %1386, %v318_v33  }
  0x29   : > { %1259 = vmatmul.mubr.msk.bf16.gmra.mrb[8].mxu0 %vm439_vm0, %v1389_v14 }
  0x2a   : > { %1320 = vmatmul.mubr.msk.bf16.gmra.mrb[8].mxu1 %vm439_vm0, %v1392_v25  ;;  %526 = vmatprep.mubr.bf16.mxu0 %v1427_v0 }
  0x2b   : > { %1323 = vmatprep.mubr.msk.bf16.mxu1 %vm439_vm0, %v1393_v26 }
  0x31   : > { %1260 = vmatmul.mubr.msk.bf16.gmra.mrb[12].mxu0 %vm439_vm0, %v1390_v19 }
  0x32   : > { %1324 = vmatmul.mubr.msk.bf16.gmra.mrb[12].mxu1 %vm439_vm0, %v1394_v31  ;;  %536 = vmatprep.mubr.bf16.mxu0 %v1427_v0 }
  0x33   : > { %842 = vmatprep.mubr.bf16.mxu1 %v1427_v0 }
  0x39   : > { %1261 = vmatmul.mubr.msk.bf16.gmra.mrb[16].mxu0 %vm439_vm0, %v1391_v20 }
  0x3a   : > { %546 = vmatprep.mubr.bf16.mxu0 %v1427_v0 }
  0x41   : > { %1262 = vmatmul.mubr.msk.bf16.gmra.mrb[20].mxu0 %vm439_vm0, %v1392_v25 }
  0x42   : > { %556 = vmatprep.mubr.bf16.mxu0 %v1427_v0 }
  0x49   : > { %1263 = vmatmul.mubr.msk.bf16.gmra.mrb[24].mxu0 %vm439_vm0, %v1393_v26 }
  0x4a   : > { %566 = vmatprep.mubr.bf16.mxu0 %v1427_v0 }
  0x51   : > { %1264 = vmatmul.mubr.msk.bf16.gmra.mrb[28].mxu0 %vm439_vm0, %v1394_v31 }
  0x52   : > { %1343 = vmatprep.mubr.bf16.mxu0 %v1584_v34 }
  0x88   : > { %v322_v35 = vpop.permute.xlu0 %321  ;;  %v332_v36 = vpop.permute.xlu1 %331 }
  0x8c   : > { %v327_v37 = vpop.permute.xlu0 %326  ;;  %v337_v38 = vpop.permute.xlu1 %336 }
  0x90   : > { %v1587_v39 = vpop.permute.xlu0 %341  ;;  %v1589_v40 = vpop.permute.xlu1 %346 }
  0x94   : > { %v1591_v41 = vpop.permute.xlu0 %351 }
  0x96   : > { %v1593_v42 = vpop.permute.xlu1 %356 }
  0x98   : > { %v1595_v43 = vpop.permute.xlu0 %361 }
  0x9a   : > { %v1597_v45 = vpop.permute.xlu1 %366 }
  0x9c   : > { %v1599_v7 = vpop.permute.xlu0 %371 }
  0x9e   : > { %v1601_v11 = vpop.permute.xlu1 %376 }
  0xec   : > { %v498_v44 = vpop.f32.mrb[0].mxu0 }
  0xed   : > { %v499_v46 = vadd.f32 %v498_v44, %v322_v35  ;;  %v1313_v47 = vpop.f32.mrb[0].mxu1  ;;  %v500_v48 = vpop.f32.mrb[1].mxu0 }
  0xee   : > { %v620_v49 = vadd.f32 %v1313_v47, %v332_v36  ;;  %v501_v50 = vadd.f32 %v500_v48, %v322_v35  ;;  %v611_v51 = vpop.f32.mrb[1].mxu1  ;;  %v502_v52 = vpop.f32.mrb[2].mxu0 }
  0xef   : > { %v612_v53 = vadd.f32 %v611_v51, %v322_v35  ;;  %v503_v54 = vadd.f32 %v502_v52, %v327_v37  ;;  %v1314_v55 = vpop.f32.mrb[2].mxu1  ;;  %v504_v56 = vpop.f32.mrb[3].mxu0  ;;  %v674_v61 = vmax.f32 %v499_v46, 0.0 }
  0xf0   : > { %v682_v57 = vmax.f32 %v620_v49, 0.0  ;;  %v623_v58 = vadd.f32 %v1314_v55, %v337_v38  ;;  %v505_v59 = vadd.f32 %v504_v56, %v327_v37  ;;  %v614_v60 = vpop.f32.mrb[3].mxu1  ;;  %v675_v2 = vmax.f32 %v501_v50, 0.0  ;;  %v1607_v44 = vpop.permute.xlu0 %381 }
  0xf1   : > { %v676_v62 = vmax.f32 %v612_v53, 0.0  ;;  %v677_v63 = vmax.f32 %v503_v54, 0.0  ;;  %v615_v1 = vadd.f32 %v614_v60, %v327_v37 }
  0xf2   : > { %v685_v3 = vmax.f32 %v623_v58, 0.0  ;;  %v678_v4 = vmax.f32 %v505_v59, 0.0 }
  0xf3   : > { %v738_v5 = vpack.c.bf16 %v677_v63, %v674_v61  ;;  %v679_v6 = vmax.f32 %v615_v1, 0.0 }
  0xf4   : > { %v743_v8 = vpack.c.bf16 %v685_v3, %v682_v57  ;;  %v739_v9 = vpack.c.bf16 %v678_v4, %v675_v2  ;;  %v508_v10 = vpop.f32.mrb[4].mxu0 }
  0xf5   : > { %v740_v12 = vpack.c.bf16 %v679_v6, %v676_v62  ;;  %v509_v13 = vadd.f32 %v508_v10, %v332_v36  ;;  %v1317_v14 = vpop.f32.mrb[4].mxu1  ;;  %v510_v15 = vpop.f32.mrb[5].mxu0 }
  0xf6   : > { %v636_v16 = vadd.f32 %v1317_v14, %v1591_v41  ;;  %v511_v17 = vadd.f32 %v510_v15, %v332_v36  ;;  %v627_v18 = vpop.f32.mrb[5].mxu1  ;;  %v512_v19 = vpop.f32.mrb[6].mxu0  ;;  %810 = vmatprep.subr.bf16.mxu1 %v739_v9 }
  0xf7   : > { %v628_v20 = vadd.f32 %v627_v18, %v1587_v39  ;;  %v513_v21 = vadd.f32 %v512_v19, %v337_v38  ;;  %v1318_v22 = vpop.f32.mrb[6].mxu1  ;;  %1327 = vmatprep.subr.bf16.mxu0 %v740_v12  ;;  %v514_v23 = vpop.f32.mrb[7].mxu0  ;;  %811 = vmatpush1.bf16.msra.mxu1 %v738_v5  ;;  %v680_v28 = vmax.f32 %v509_v13, 0.0 }
  0xf8   : > { %v694_v24 = vmax.f32 %v636_v16, 0.0  ;;  %v639_v25 = vadd.f32 %v1318_v22, %v1593_v42  ;;  %v515_v26 = vadd.f32 %v514_v23, %v337_v38  ;;  %v630_v27 = vpop.f32.mrb[7].mxu1  ;;  %1328 = vmatpush3.bf16.msra.mxu0 %v740_v12  ;;  %v681_v32 = vmax.f32 %v511_v17, 0.0  ;;  %v1609_v38 = vpop.permute.xlu1 %386 }
  0xf9   : > { %v688_v29 = vmax.f32 %v628_v20, 0.0  ;;  %v683_v30 = vmax.f32 %v513_v21, 0.0  ;;  %v631_v31 = vadd.f32 %v630_v27, %v1589_v40  ;;  %1329 = vmatprep.subr.bf16.mxu0 %v743_v8  ;;  %v1619_v12 = vpop.permute.xlu0 %391 }
  0xfa   : > { %v697_v33 = vmax.f32 %v639_v25, 0.0  ;;  %v684_v35 = vmax.f32 %v515_v26, 0.0 }
  0xfb   : > { %v741_v36 = vpack.c.bf16 %v683_v30, %v680_v28  ;;  %v691_v37 = vmax.f32 %v631_v31, 0.0 }
  0xfc   : > { %v749_v46 = vpack.c.bf16 %v697_v33, %v694_v24  ;;  %v742_v47 = vpack.c.bf16 %v684_v35, %v681_v32  ;;  %1330 = vmatpush3.bf16.msra.mxu0 %v743_v8  ;;  %v518_v48 = vpop.f32.mrb[8].mxu0 }
  0xfd   : > { %v746_v49 = vpack.c.bf16 %v691_v37, %v688_v29  ;;  %v519_v50 = vadd.f32 %v518_v48, %v1587_v39  ;;  %v1321_v51 = vpop.f32.mrb[8].mxu1  ;;  %v520_v52 = vpop.f32.mrb[9].mxu0 }
  0xfe   : > { %v652_v53 = vadd.f32 %v1321_v51, %v1599_v7  ;;  %v521_v54 = vadd.f32 %v520_v52, %v1587_v39  ;;  %v643_v55 = vpop.f32.mrb[9].mxu1  ;;  %v522_v56 = vpop.f32.mrb[10].mxu0  ;;  %812 = vmatprep.subr.bf16.mxu1 %v742_v47 }
  0xff   : > { %v644_v57 = vadd.f32 %v643_v55, %v1595_v43  ;;  %v523_v58 = vadd.f32 %v522_v56, %v1589_v40  ;;  %v1322_v59 = vpop.f32.mrb[10].mxu1  ;;  %1331 = vmatprep.subr.bf16.mxu0 %v746_v49  ;;  %v524_v60 = vpop.f32.mrb[11].mxu0  ;;  %813 = vmatpush1.bf16.msra.mxu1 %v741_v36  ;;  %v686_v2 = vmax.f32 %v519_v50, 0.0 }
 0x100   : > { %v706_v61 = vmax.f32 %v652_v53, 0.0  ;;  %v655_v62 = vadd.f32 %v1322_v59, %v1601_v11  ;;  %v525_v63 = vadd.f32 %v524_v60, %v1589_v40  ;;  %v646_v1 = vpop.f32.mrb[11].mxu1  ;;  %1332 = vmatpush3.bf16.msra.mxu0 %v746_v49  ;;  %v687_v5 = vmax.f32 %v521_v54, 0.0  ;;  %v1621_v40 = vpop.permute.xlu1 %396 }
 0x101   : > { %v700_v39 = vmax.f32 %v644_v57, 0.0  ;;  %v689_v3 = vmax.f32 %v523_v58, 0.0  ;;  %v647_v4 = vadd.f32 %v646_v1, %v1597_v45  ;;  %1333 = vmatprep.subr.bf16.mxu0 %v749_v46 }
 0x102   : > { %v709_v6 = vmax.f32 %v655_v62, 0.0  ;;  %v690_v8 = vmax.f32 %v525_v63, 0.0 }
 0x103   : > { %v744_v9 = vpack.c.bf16 %v689_v3, %v686_v2  ;;  %v703_v10 = vmax.f32 %v647_v4, 0.0 }
 0x104   : > { %v755_v13 = vpack.c.bf16 %v709_v6, %v706_v61  ;;  %v745_v14 = vpack.c.bf16 %v690_v8, %v687_v5  ;;  %1334 = vmatpush3.bf16.msra.mxu0 %v749_v46  ;;  %v528_v15 = vpop.f32.mrb[12].mxu0 }
 0x105   : > { %v752_v16 = vpack.c.bf16 %v703_v10, %v700_v39  ;;  %v529_v17 = vadd.f32 %v528_v15, %v1591_v41  ;;  %v1325_v18 = vpop.f32.mrb[12].mxu1  ;;  %v530_v19 = vpop.f32.mrb[13].mxu0  ;;  %v1643_v39 = vld [vmem:[%s1800_s3 + $0x10] sm:$0xff]  }
 0x106   : > { %v668_v20 = vadd.f32 %v1325_v18, %v1619_v12  ;;  %v531_v21 = vadd.f32 %v530_v19, %v1591_v41  ;;  %v659_v22 = vpop.f32.mrb[13].mxu1  ;;  %v532_v23 = vpop.f32.mrb[14].mxu0  ;;  %814 = vmatprep.subr.bf16.mxu1 %v745_v14  ;;  %v1399_v19 = vld [vmem:[%s1800_s3 + $0x20] sm:$0xff]  }
 0x107   : > { %v660_v24 = vadd.f32 %v659_v22, %v1607_v44  ;;  %v533_v25 = vadd.f32 %v532_v23, %v1593_v42  ;;  %v1326_v26 = vpop.f32.mrb[14].mxu1  ;;  %1335 = vmatprep.subr.bf16.mxu0 %v752_v16  ;;  %v534_v27 = vpop.f32.mrb[15].mxu0  ;;  %815 = vmatpush1.bf16.msra.mxu1 %v744_v9  ;;  %v692_v32 = vmax.f32 %v529_v17, 0.0 }
 0x108   : > { %v718_v28 = vmax.f32 %v668_v20, 0.0  ;;  %v671_v29 = vadd.f32 %v1326_v26, %v1621_v40  ;;  %v535_v30 = vadd.f32 %v534_v27, %v1593_v42  ;;  %v662_v31 = vpop.f32.mrb[15].mxu1  ;;  %1336 = vmatpush3.bf16.msra.mxu0 %v752_v16  ;;  %v693_v36 = vmax.f32 %v531_v21, 0.0 }
 0x109   : > { %v712_v41 = vmax.f32 %v660_v24, 0.0  ;;  %v695_v33 = vmax.f32 %v533_v25, 0.0  ;;  %v663_v35 = vadd.f32 %v662_v31, %v1609_v38  ;;  %1337 = vmatprep.subr.bf16.mxu0 %v755_v13  ;;  %v1400_v31 = vld [vmem:[%s1800_s3 + $0x28] sm:$0xff]  }
 0x10a   : > { %v721_v37 = vmax.f32 %v671_v29, 0.0  ;;  %v696_v46 = vmax.f32 %v535_v30, 0.0 }
 0x10b   : > { %v747_v47 = vpack.c.bf16 %v695_v33, %v692_v32  ;;  %v715_v48 = vmax.f32 %v663_v35, 0.0 }
 0x10c   : > { %v761_v49 = vpack.c.bf16 %v721_v37, %v718_v28  ;;  %v748_v50 = vpack.c.bf16 %v696_v46, %v693_v36  ;;  %1338 = vmatpush3.bf16.msra.mxu0 %v755_v13  ;;  %v538_v51 = vpop.f32.mrb[16].mxu0 }
 0x10d   : > { %v758_v52 = vpack.c.bf16 %v715_v48, %v712_v41  ;;  %v539_v42 = vadd.f32 %v538_v51, %v1595_v43  ;;  %v540_v53 = vpop.f32.mrb[17].mxu0  ;;  %v1401_v41 = vld [vmem:[%s1800_s3 + $0x30] sm:$0xff]  }
 0x10e   : > { %v541_v54 = vadd.f32 %v540_v53, %v1595_v43  ;;  %v542_v55 = vpop.f32.mrb[18].mxu0  ;;  %816 = vmatprep.subr.bf16.mxu1 %v748_v50  ;;  %v1638_v43 = vld [vmem:[%s1800_s3 + $0x8] sm:$0xff]  }
 0x10f   : > { %v543_v56 = vadd.f32 %v542_v55, %v1597_v45  ;;  %1339 = vmatprep.subr.bf16.mxu0 %v758_v52  ;;  %v544_v57 = vpop.f32.mrb[19].mxu0  ;;  %817 = vmatpush1.bf16.msra.mxu1 %v747_v47  ;;  %v698_v59 = vmax.f32 %v539_v42, 0.0  ;;  %v1402_v42 = vld [vmem:[%s1800_s3 + $0x38] sm:$0xff]  }
 0x110   : > { %v545_v58 = vadd.f32 %v544_v57, %v1597_v45  ;;  %1340 = vmatpush3.bf16.msra.mxu0 %v758_v52  ;;  %v699_v61 = vmax.f32 %v541_v54, 0.0 }
 0x111   : > { %v701_v60 = vmax.f32 %v543_v56, 0.0  ;;  %1341 = vmatprep.subr.bf16.mxu0 %v761_v49 }
 0x112   : > { %v702_v62 = vmax.f32 %v545_v58, 0.0 }
 0x113   : > { %v750_v63 = vpack.c.bf16 %v701_v60, %v698_v59 }
 0x114   : > { %v751_v1 = vpack.c.bf16 %v702_v62, %v699_v61  ;;  %1342 = vmatpush3.bf16.msra.mxu0 %v761_v49  ;;  %v548_v2 = vpop.f32.mrb[20].mxu0 }
 0x115   : > { %v549_v45 = vadd.f32 %v548_v2, %v1599_v7  ;;  %v550_v3 = vpop.f32.mrb[21].mxu0 }
 0x116   : > { %v551_v4 = vadd.f32 %v550_v3, %v1599_v7  ;;  %v552_v5 = vpop.f32.mrb[22].mxu0  ;;  %818 = vmatprep.subr.bf16.mxu1 %v751_v1  ;;  %v1398_v7 = vld [vmem:[%s1800_s3 + $0x18] sm:$0xff]  }
 0x117   : > { %v553_v6 = vadd.f32 %v552_v5, %v1601_v11  ;;  %v554_v8 = vpop.f32.mrb[23].mxu0  ;;  %819 = vmatpush1.bf16.msra.mxu1 %v750_v63  ;;  %1344 = vmatmul.mubr.bf16.vlgmr.msra.gmra.mrb[32].mxu0 %v1638_v43  ;;  %v704_v10 = vmax.f32 %v549_v45, 0.0 }
 0x118   : > { %v555_v9 = vadd.f32 %v554_v8, %v1601_v11  ;;  %1347 = vmatprep.mubr.bf16.mxu0 %v1643_v39  ;;  %v705_v14 = vmax.f32 %v551_v4, 0.0 }
 0x119   : > { %v707_v13 = vmax.f32 %v553_v6, 0.0 }
 0x11a   : > { %v708_v15 = vmax.f32 %v555_v9, 0.0 }
 0x11b   : > { %v753_v16 = vpack.c.bf16 %v707_v13, %v704_v10 }
 0x11c   : > { %v754_v17 = vpack.c.bf16 %v708_v15, %v705_v14  ;;  %v558_v18 = vpop.f32.mrb[24].mxu0 }
 0x11d   : > { %v559_v20 = vadd.f32 %v558_v18, %v1607_v44  ;;  %v560_v11 = vpop.f32.mrb[25].mxu0 }
 0x11e   : > { %v561_v21 = vadd.f32 %v560_v11, %v1607_v44  ;;  %v562_v22 = vpop.f32.mrb[26].mxu0  ;;  %820 = vmatprep.subr.bf16.mxu1 %v754_v17 }
 0x11f   : > { %v563_v23 = vadd.f32 %v562_v22, %v1609_v38  ;;  %v564_v24 = vpop.f32.mrb[27].mxu0  ;;  %821 = vmatpush1.bf16.msra.mxu1 %v753_v16  ;;  %1348 = vmatmul.mubr.bf16.gmra.mrb[36].mxu0 %v1398_v7  ;;  %v710_v26 = vmax.f32 %v559_v20, 0.0 }
 0x120   : > { %v565_v25 = vadd.f32 %v564_v24, %v1609_v38  ;;  %1351 = vmatprep.mubr.bf16.mxu0 %v1399_v19  ;;  %v711_v28 = vmax.f32 %v561_v21, 0.0 }
 0x121   : > { %v713_v27 = vmax.f32 %v563_v23, 0.0 }
 0x122   : > { %v714_v29 = vmax.f32 %v565_v25, 0.0 }
 0x123   : > { %v756_v30 = vpack.c.bf16 %v713_v27, %v710_v26 }
 0x124   : > { %v757_v44 = vpack.c.bf16 %v714_v29, %v711_v28  ;;  %v568_v32 = vpop.f32.mrb[28].mxu0 }
 0x125   : > { %v569_v33 = vadd.f32 %v568_v32, %v1619_v12  ;;  %v570_v35 = vpop.f32.mrb[29].mxu0 }
 0x126   : > { %v571_v38 = vadd.f32 %v570_v35, %v1619_v12  ;;  %v572_v36 = vpop.f32.mrb[30].mxu0  ;;  %822 = vmatprep.subr.bf16.mxu1 %v757_v44 }
 0x127   : > { %v573_v37 = vadd.f32 %v572_v36, %v1621_v40  ;;  %v574_v46 = vpop.f32.mrb[31].mxu0  ;;  %823 = vmatpush1.bf16.msra.mxu1 %v756_v30  ;;  %1352 = vmatmul.mubr.bf16.gmra.mrb[40].mxu0 %v1400_v31  ;;  %v716_v48 = vmax.f32 %v569_v33, 0.0 }
 0x128   : > { %v575_v47 = vadd.f32 %v574_v46, %v1621_v40  ;;  %1355 = vmatprep.mubr.bf16.mxu0 %v1401_v41  ;;  %v717_v50 = vmax.f32 %v571_v38, 0.0 }
 0x129   : > { %v719_v49 = vmax.f32 %v573_v37, 0.0 }
 0x12a   : > { %v720_v51 = vmax.f32 %v575_v47, 0.0 }
 0x12b   : > { %v759_v52 = vpack.c.bf16 %v719_v49, %v716_v48 }
 0x12c   : > { %v760_v12 = vpack.c.bf16 %v720_v51, %v717_v50 }
 0x12e   : > { %824 = vmatprep.subr.bf16.mxu1 %v760_v12 }
 0x12f   : > { %825 = vmatpush1.bf16.msra.mxu1 %v759_v52  ;;  %1356 = vmatmul.mubr.bf16.gmra.mrb[44].mxu0 %v1402_v42 }
 0x132   : > { %843 = vmatmul.mubr.bf16.vlgmr.msra.gmra.mrb[16].mxu1 %v1584_v34 }
 0x133   : > { %852 = vmatprep.mubr.bf16.mxu1 %v1427_v0 }
 0x13a   : > { %853 = vmatmul.mubr.bf16.gmra.mrb[20].mxu1 %v1638_v43 }
 0x13b   : > { %862 = vmatprep.mubr.bf16.mxu1 %v1427_v0 }
 0x142   : > { %863 = vmatmul.mubr.bf16.gmra.mrb[24].mxu1 %v1643_v39 }
 0x143   : > { %872 = vmatprep.mubr.bf16.mxu1 %v1427_v0 }
 0x14a   : > { %873 = vmatmul.mubr.bf16.gmra.mrb[28].mxu1 %v1398_v7 }
 0x14b   : > { %882 = vmatprep.mubr.bf16.mxu1 %v1427_v0 }
 0x152   : > { %883 = vmatmul.mubr.bf16.gmra.mrb[32].mxu1 %v1399_v19 }
 0x153   : > { %892 = vmatprep.mubr.bf16.mxu1 %v1427_v0 }
 0x15a   : > { %893 = vmatmul.mubr.bf16.gmra.mrb[36].mxu1 %v1400_v31 }
 0x15b   : > { %902 = vmatprep.mubr.bf16.mxu1 %v1427_v0 }
 0x162   : > { %903 = vmatmul.mubr.bf16.gmra.mrb[40].mxu1 %v1401_v41 }
 0x163   : > { %912 = vmatprep.mubr.bf16.mxu1 %v1427_v0 }
 0x16a   : > { %913 = vmatmul.mubr.bf16.gmra.mrb[44].mxu1 %v1402_v42 }
 0x1ea   : > { %v1345_v34 = vpop.f32.mrb[32].mxu0 }
 0x1eb   : > { %v957_v40 = vpop.f32.mrb[33].mxu0 }
 0x1ec   : > { %v1346_v53 = vpop.f32.mrb[34].mxu0 }
 0x1ed   : > { %v960_v54 = vpop.f32.mrb[35].mxu0 }
 0x1f2   : > { %v1349_v55 = vpop.f32.mrb[36].mxu0 }
 0x1f3   : > { %v973_v56 = vpop.f32.mrb[37].mxu0 }
 0x1f4   : > { %v1350_v57 = vpop.f32.mrb[38].mxu0 }
 0x1f5   : > { %v976_v58 = vpop.f32.mrb[39].mxu0 }
 0x1fa   : > { %v1684_v59 = vpop.f32.mrb[40].mxu0 }
 0x1fb   : > { %v989_v60 = vpop.f32.mrb[41].mxu0 }
 0x1fc   : > { %v1686_v61 = vpop.f32.mrb[42].mxu0 }
 0x1fd   : > { %v992_v62 = vpop.f32.mrb[43].mxu0 }
 0x202   : > { %v1688_v63 = vpop.f32.mrb[44].mxu0 }
 0x203   : > { %v1690_v43 = vpop.f32.mrb[45].mxu0 }
 0x204   : > { %v1692_v0 = vpop.f32.mrb[46].mxu0 }
 0x205   : > { %v844_v1 = vpop.f32.mrb[16].mxu1  ;;  %v1694_v2 = vpop.f32.mrb[47].mxu0 }
 0x206   : > { %v846_v39 = vpop.f32.mrb[17].mxu1 }
 0x207   : > { %v1020_v45 = vmax.f32 %v844_v1, %v846_v39  ;;  %v848_v3 = vpop.f32.mrb[18].mxu1 }
 0x208   : > { %v850_v4 = vpop.f32.mrb[19].mxu1 }
 0x209   : > { %v1024_v5 = vmax.f32 %v848_v3, %v850_v4  ;;  %v1021_v6 = vmax.f32 %v1020_v45, %v957_v40  ;;  %v1085_v4 = vld [vmem:[%s1801_s4 + $0x8] sm:$0xff] }
 0x20b   : > { %v1025_v8 = vmax.f32 %v1024_v5, %v960_v54  ;;  %1022 = vmax.xlane.f32.xlu0 %v1021_v6 }
 0x20d   : > { %1026 = vmax.xlane.f32.xlu1 %v1025_v8  ;;  %v854_v9 = vpop.f32.mrb[20].mxu1 }
 0x20e   : > { %v856_v10 = vpop.f32.mrb[21].mxu1 }
 0x20f   : > { %v1028_v13 = vmax.f32 %v854_v9, %v856_v10  ;;  %v858_v14 = vpop.f32.mrb[22].mxu1  ;;  %v1086_v9 = vld [vmem:[%s1801_s4 + $0x10] sm:$0xff] }
 0x210   : > { %v860_v15 = vpop.f32.mrb[23].mxu1 }
 0x211   : > { %v1032_v16 = vmax.f32 %v858_v14, %v860_v15  ;;  %v1029_v7 = vmax.f32 %v1028_v13, %v1345_v34  ;;  %v1087_v14 = vld [vmem:[%s1801_s4 + $0x18] sm:$0xff] }
 0x213   : > { %1030 = vmax.xlane.f32.xlu0 %v1029_v7  ;;  %v1033_v17 = vmax.f32 %v1032_v16, %v1346_v53 }
 0x215   : > { %v864_v18 = vpop.f32.mrb[24].mxu1 }
 0x216   : > { %v866_v19 = vpop.f32.mrb[25].mxu1 }
 0x217   : > { %v1036_v20 = vmax.f32 %v864_v18, %v866_v19  ;;  %1034 = vmax.xlane.f32.xlu0 %v1033_v17  ;;  %v868_v11 = vpop.f32.mrb[26].mxu1  ;;  %v1088_v17 = vld [vmem:[%s1801_s4 + $0x20] sm:$0xff] }
 0x218   : > { %v870_v21 = vpop.f32.mrb[27].mxu1 }
 0x219   : > { %v1040_v22 = vmax.f32 %v868_v11, %v870_v21  ;;  %v1037_v23 = vmax.f32 %v1036_v20, %v973_v56  ;;  %v1089_v20 = vld [vmem:[%s1801_s4 + $0x28] sm:$0xff] }
 0x21b   : > { %v1041_v24 = vmax.f32 %v1040_v22, %v976_v58  ;;  %1038 = vmax.xlane.f32.xlu1 %v1037_v23 }
 0x21d   : > { %1042 = vmax.xlane.f32.xlu0 %v1041_v24  ;;  %v874_v25 = vpop.f32.mrb[28].mxu1 }
 0x21e   : > { %v876_v26 = vpop.f32.mrb[29].mxu1 }
 0x21f   : > { %v1044_v27 = vmax.f32 %v874_v25, %v876_v26  ;;  %v878_v28 = vpop.f32.mrb[30].mxu1  ;;  %v1090_v25 = vld [vmem:[%s1801_s4 + $0x30] sm:$0xff] }
 0x220   : > { %v880_v29 = vpop.f32.mrb[31].mxu1 }
 0x221   : > { %v1048_v30 = vmax.f32 %v878_v28, %v880_v29  ;;  %v1045_v31 = vmax.f32 %v1044_v27, %v1349_v55  ;;  %v1091_v27 = vld [vmem:[%s1801_s4 + $0x38] sm:$0xff] }
 0x223   : > { %1046 = vmax.xlane.f32.xlu1 %v1045_v31  ;;  %v1049_v44 = vmax.f32 %v1048_v30, %v1350_v57 }
 0x225   : > { %1050 = vmax.xlane.f32.xlu0 %v1049_v44  ;;  %v884_v32 = vpop.f32.mrb[32].mxu1 }
 0x226   : > { %v886_v41 = vpop.f32.mrb[33].mxu1 }
 0x227   : > { %v1052_v33 = vmax.f32 %v884_v32, %v886_v41  ;;  %v888_v35 = vpop.f32.mrb[34].mxu1  ;;  %v1092_v32 = vld [vmem:[%s1801_s4 + $0x40] sm:$0xff] }
 0x228   : > { %v890_v38 = vpop.f32.mrb[35].mxu1 }
 0x229   : > { %v1056_v36 = vmax.f32 %v888_v35, %v890_v38  ;;  %v1053_v37 = vmax.f32 %v1052_v33, %v989_v60  ;;  %v1093_v33 = vld [vmem:[%s1801_s4 + $0x48] sm:$0xff] }
 0x22b   : > { %v1057_v46 = vmax.f32 %v1056_v36, %v992_v62  ;;  %1054 = vmax.xlane.f32.xlu1 %v1053_v37 }
 0x22d   : > { %1058 = vmax.xlane.f32.xlu0 %v1057_v46  ;;  %v894_v47 = vpop.f32.mrb[36].mxu1 }
 0x22e   : > { %v896_v48 = vpop.f32.mrb[37].mxu1 }
 0x22f   : > { %v1060_v49 = vmax.f32 %v894_v47, %v896_v48  ;;  %v898_v50 = vpop.f32.mrb[38].mxu1  ;;  %v1094_v47 = vld [vmem:[%s1801_s4 + $0x50] sm:$0xff] }
 0x230   : > { %v900_v51 = vpop.f32.mrb[39].mxu1 }
 0x231   : > { %v1064_v52 = vmax.f32 %v898_v50, %v900_v51  ;;  %v1061_v42 = vmax.f32 %v1060_v49, %v1684_v59  ;;  %v1095_v49 = vld [vmem:[%s1801_s4 + $0x58] sm:$0xff] }
 0x233   : > { %1062 = vmax.xlane.f32.xlu1 %v1061_v42  ;;  %v1065_v12 = vmax.f32 %v1064_v52, %v1686_v61 }
 0x235   : > { %1066 = vmax.xlane.f32.xlu0 %v1065_v12  ;;  %v904_v34 = vpop.f32.mrb[40].mxu1 }
 0x236   : > { %v906_v40 = vpop.f32.mrb[41].mxu1 }
 0x237   : > { %v1068_v53 = vmax.f32 %v904_v34, %v906_v40  ;;  %v908_v54 = vpop.f32.mrb[42].mxu1  ;;  %v1096_v34 = vld [vmem:[%s1801_s4 + $0x60] sm:$0xff] }
 0x238   : > { %v910_v55 = vpop.f32.mrb[43].mxu1 }
 0x239   : > { %v1072_v56 = vmax.f32 %v908_v54, %v910_v55  ;;  %v1069_v57 = vmax.f32 %v1068_v53, %v1690_v43  ;;  %v1084_v43 = vld [vmem:[%s1801_s4] sm:$0xff]  ;;  %v1097_v53 = vld [vmem:[%s1801_s4 + $0x68] sm:$0xff] }
 0x23b   : > { %v1073_v58 = vmax.f32 %v1072_v56, %v1694_v2  ;;  %1070 = vmax.xlane.f32.xlu1 %v1069_v57 }
 0x23d   : > { %1074 = vmax.xlane.f32.xlu0 %v1073_v58  ;;  %v914_v60 = vpop.f32.mrb[44].mxu1 }
 0x23e   : > { %v916_v62 = vpop.f32.mrb[45].mxu1 }
 0x23f   : > { %v1076_v59 = vmax.f32 %v914_v60, %v916_v62  ;;  %v918_v1 = vpop.f32.mrb[46].mxu1  ;;  %v1098_v60 = vld [vmem:[%s1801_s4 + $0x70] sm:$0xff] }
 0x240   : > { %v920_v39 = vpop.f32.mrb[47].mxu1 }
 0x241   : > { %v1080_v61 = vmax.f32 %v918_v1, %v920_v39  ;;  %v1077_v45 = vmax.f32 %v1076_v59, %v1688_v63  ;;  %v1099_v59 = vld [vmem:[%s1801_s4 + $0x78] sm:$0xff] }
 0x243   : > { %1078 = vmax.xlane.f32.xlu1 %v1077_v45  ;;  %v1081_v3 = vmax.f32 %v1080_v61, %v1692_v0 }
 0x245   : > { %1082 = vmax.xlane.f32.xlu0 %v1081_v3 }
 0x298   : > { %v1023_v2 = vpop.xlane.xlu0 %1022 }
 0x299   : > { %v1100_v5 = vadd.f32 %v1084_v43, %v1023_v2 }
 0x29a   : > { %v1027_v63 = vpop.xlane.xlu1 %1026 }
 0x29b   : > { %v1116_v0 = vmax.f32 %v1100_v5, 0.0  ;;  %v1101_v6 = vadd.f32 %v1085_v4, %v1027_v63 }
 0x29d   : > { %1133 = vst.msk [vmem:[%s1712_s9] sm:$0xff] %vm1132_vm1, %v1116_v0  ;;  %v1117_v8 = vmax.f32 %v1101_v6, 0.0 }
 0x29f   : > { %1134 = vst.msk [vmem:[%s1712_s9 + $0x8] sm:$0xff] %vm1132_vm1, %v1117_v8 }
 0x2a0   : > { %v1031_v10 = vpop.xlane.xlu0 %1030 }
 0x2a1   : > { %v1102_v13 = vadd.f32 %v1086_v9, %v1031_v10 }
 0x2a3   : > { %v1118_v15 = vmax.f32 %v1102_v13, 0.0 }
 0x2a4   : > { %v1035_v16 = vpop.xlane.xlu0 %1034 }
 0x2a5   : > { %1135 = vst.msk [vmem:[%s1712_s9 + $0x10] sm:$0xff] %vm1132_vm1, %v1118_v15  ;;  %v1103_v7 = vadd.f32 %v1087_v14, %v1035_v16 }
 0x2a7   : > { %v1119_v18 = vmax.f32 %v1103_v7, 0.0 }
 0x2a8   : > { %v1039_v19 = vpop.xlane.xlu1 %1038 }
 0x2a9   : > { %1136 = vst.msk [vmem:[%s1712_s9 + $0x18] sm:$0xff] %vm1132_vm1, %v1119_v18  ;;  %v1104_v11 = vadd.f32 %v1088_v17, %v1039_v19 }
 0x2aa   : > { %v1043_v21 = vpop.xlane.xlu0 %1042 }
 0x2ab   : > { %v1120_v22 = vmax.f32 %v1104_v11, 0.0  ;;  %v1105_v23 = vadd.f32 %v1089_v20, %v1043_v21 }
 0x2ad   : > { %1137 = vst.msk [vmem:[%s1712_s9 + $0x20] sm:$0xff] %vm1132_vm1, %v1120_v22  ;;  %v1121_v24 = vmax.f32 %v1105_v23, 0.0 }
 0x2af   : > { %1138 = vst.msk [vmem:[%s1712_s9 + $0x28] sm:$0xff] %vm1132_vm1, %v1121_v24 }
 0x2b0   : > { %v1047_v26 = vpop.xlane.xlu1 %1046 }
 0x2b1   : > { %v1106_v28 = vadd.f32 %v1090_v25, %v1047_v26 }
 0x2b2   : > { %v1051_v29 = vpop.xlane.xlu0 %1050 }
 0x2b3   : > { %v1122_v30 = vmax.f32 %v1106_v28, 0.0  ;;  %v1107_v31 = vadd.f32 %v1091_v27, %v1051_v29 }
 0x2b5   : > { %1139 = vst.msk [vmem:[%s1712_s9 + $0x30] sm:$0xff] %vm1132_vm1, %v1122_v30  ;;  %v1123_v44 = vmax.f32 %v1107_v31, 0.0 }
 0x2b7   : > { %1140 = vst.msk [vmem:[%s1712_s9 + $0x38] sm:$0xff] %vm1132_vm1, %v1123_v44 }
 0x2b8   : > { %v1055_v41 = vpop.xlane.xlu1 %1054 }
 0x2b9   : > { %v1108_v35 = vadd.f32 %v1092_v32, %v1055_v41 }
 0x2ba   : > { %v1059_v38 = vpop.xlane.xlu0 %1058 }
 0x2bb   : > { %v1124_v36 = vmax.f32 %v1108_v35, 0.0  ;;  %v1109_v37 = vadd.f32 %v1093_v33, %v1059_v38 }
 0x2bd   : > { %1141 = vst.msk [vmem:[%s1712_s9 + $0x40] sm:$0xff] %vm1132_vm1, %v1124_v36  ;;  %v1125_v46 = vmax.f32 %v1109_v37, 0.0 }
 0x2bf   : > { %1142 = vst.msk [vmem:[%s1712_s9 + $0x48] sm:$0xff] %vm1132_vm1, %v1125_v46 }
 0x2c0   : > { %v1063_v48 = vpop.xlane.xlu1 %1062 }
 0x2c1   : > { %v1110_v50 = vadd.f32 %v1094_v47, %v1063_v48 }
 0x2c2   : > { %v1067_v51 = vpop.xlane.xlu0 %1066 }
 0x2c3   : > { %v1126_v52 = vmax.f32 %v1110_v50, 0.0  ;;  %v1111_v42 = vadd.f32 %v1095_v49, %v1067_v51 }
 0x2c5   : > { %1143 = vst.msk [vmem:[%s1712_s9 + $0x50] sm:$0xff] %vm1132_vm1, %v1126_v52  ;;  %v1127_v12 = vmax.f32 %v1111_v42, 0.0 }
 0x2c7   : > { %1144 = vst.msk [vmem:[%s1712_s9 + $0x58] sm:$0xff] %vm1132_vm1, %v1127_v12 }
 0x2c8   : > { %v1071_v40 = vpop.xlane.xlu1 %1070 }
 0x2c9   : > { %v1112_v54 = vadd.f32 %v1096_v34, %v1071_v40 }
 0x2ca   : > { %v1075_v55 = vpop.xlane.xlu0 %1074 }
 0x2cb   : > { %v1128_v56 = vmax.f32 %v1112_v54, 0.0  ;;  %v1113_v57 = vadd.f32 %v1097_v53, %v1075_v55 }
 0x2cd   : > { %1145 = vst.msk [vmem:[%s1712_s9 + $0x60] sm:$0xff] %vm1132_vm1, %v1128_v56  ;;  %v1129_v58 = vmax.f32 %v1113_v57, 0.0 }
 0x2cf   : > { %1146 = vst.msk [vmem:[%s1712_s9 + $0x68] sm:$0xff] %vm1132_vm1, %v1129_v58 }
 0x2d0   : > { %v1079_v62 = vpop.xlane.xlu1 %1078 }
 0x2d1   : > { %v1114_v1 = vadd.f32 %v1098_v60, %v1079_v62 }
 0x2d2   : > { %v1083_v39 = vpop.xlane.xlu0 %1082 }
 0x2d3   : > { %v1130_v61 = vmax.f32 %v1114_v1, 0.0  ;;  %v1115_v45 = vadd.f32 %v1099_v59, %v1083_v39 }
 0x2d5   : > { %1147 = vst.msk [vmem:[%s1712_s9 + $0x70] sm:$0xff] %vm1132_vm1, %v1130_v61  ;;  %v1131_v3 = vmax.f32 %v1115_v45, 0.0 }
 0x2d7   : > { %1148 = vst.msk [vmem:[%s1712_s9 + $0x78] sm:$0xff] %vm1132_vm1, %v1131_v3 }
 0x2d8 PF: > { %s15_s20 = sadd.s32 1, %s1425_s20   ;;  %s1803_s18 = smov %s1421_s19 }
 0x2d9   : > { %p12_p5 = scmp.ge.s32.totalorder %s15_s20, 4   ;;  %s1804_s19 = smov %s1806_s21 }
 0x2db   :  { %14 = sbr.rel (!%p12_p5) target bundleno = 2 (0x2), region = 70 }

</bundles_post_ra>
